<compile_context>
chip_gen: v7x
topology: tpu7x:2x2x1
jax: 0.10.0
libtpu: 0.0.40
codegen_flags: <defaults>
</compile_context>

<pallas_src>
import functools

import jax
import jax.numpy as jnp
from jax.experimental import pallas as pl
from jax.experimental.pallas import tpu as pltpu


def _round_up(x, m):
    return (x + m - 1) // m * m


# ---------------------------------------------------------------------------
# Fused Pallas kernel: conv-as-matmul + bias + ReLU + GAP + classifier heads
# ---------------------------------------------------------------------------
def _fused_kernel(patches_ref, cw_ref, cb_ref, hw_w_ref, hb_ref, out_ref,
                  acc_ref, *, inv_hw):
    """Grid = (b, s).  Per spatial tile: (B_blk*HW_blk, K) @ (K, F_pad) on the MXU
    (bf16 in, f32 acc), bias+ReLU epilogue in f32, reduce over the tile into the
    resident (B_blk, F_pad) accumulator.  On the last spatial tile apply the
    global-average-pool scale and the fused (F_pad, O_pad) heads matmul."""
    s = pl.program_id(1)

    @pl.when(s == 0)
    def _init():
        acc_ref[...] = jnp.zeros_like(acc_ref)

    p = patches_ref[...]                                  # (B_blk, HW_blk, K) bf16
    bb, hwb, k = p.shape
    # Single large-M 2-D matmul (better MXU utilization than per-image matmuls).
    y = jnp.dot(p.reshape(bb * hwb, k), cw_ref[...],
                preferred_element_type=jnp.float32)       # (B_blk*HW_blk, F_pad) f32
    y = jnp.maximum(y + cb_ref[...], 0.0)                 # bias + ReLU (f32 epilogue)
    # Reduce the spatial tile straight into the accumulator (no activation store).
    acc_ref[...] += y.reshape(bb, hwb, -1).sum(axis=1)

    @pl.when(s == pl.num_programs(1) - 1)
    def _finalize():
        feat = acc_ref[...] * inv_hw                      # GAP via precomputed 1/(H*W)
        logits = jnp.dot(feat.astype(hw_w_ref.dtype), hw_w_ref[...],
                         preferred_element_type=jnp.float32) + hb_ref[...]
        out_ref[...] = logits.astype(out_ref.dtype)       # lane-dense (B_blk, O_pad)


# ---------------------------------------------------------------------------
# JAX glue: im2col (bf16), tile-size selection, pallas_call wrapper
# ---------------------------------------------------------------------------
def _im2col_3x3(x_nchw):
    """NCHW -> (B, H*W, 9*C) patches for a 3x3 conv with padding=1.

    Cast to bf16 happens *before* the 9x patch expansion so the wrapper-side
    materialization / HBM traffic is halved; each patch element is an exact
    copy of an input element (or zero), so numerics match casting afterwards."""
    B, C, H, W = x_nchw.shape
    x = jnp.transpose(x_nchw, (0, 2, 3, 1)).astype(jnp.bfloat16)  # NHWC bf16
    xp = jnp.pad(x, ((0, 0), (1, 1), (1, 1), (0, 0)))
    shifts = [xp[:, i:i + H, j:j + W, :] for i in range(3) for j in range(3)]
    pat = jnp.stack(shifts, axis=3)                               # (B, H, W, 9, C)
    return pat.reshape(B, H * W, 9 * C)


def _pick_b_block(b):
    """Largest divisor of B that is <= 8 (sublane-friendly batch tile)."""
    for cand in (8, 4, 2, 1):
        if b % cand == 0:
            return cand
    return b


def _pick_hw_block(hw, b_blk, row_bytes, *, max_rows=1024,
                   vmem_budget=8 * 1024 * 1024):
    """Largest spatial tile that (a) divides HW, (b) is a multiple of 16 (layout-
    safe sublane collapse for bf16), (c) keeps B_blk*HW_blk <= max_rows, and
    (d) keeps the double-buffered patch tile under `vmem_budget` bytes — safe for
    the 64 MiB VMEM on v7x as well as 128 MiB on v5e/v6e."""
    best = None
    for t in range(16, hw + 1, 16):
        if hw % t:
            continue
        if b_blk * t > max_rows:
            continue
        if 2 * b_blk * t * row_bytes > vmem_budget:
            continue
        best = t
    return best if best is not None else hw   # tiny inputs: no spatial tiling


def multilabel_forward(x_nchw, params, *, max_rows_per_block=1024):
    """conv3x3(pad=1) -> ReLU -> GAP -> fused classifier heads, one pallas_call."""
    conv_w, conv_b, head_w, head_b = params   # already padded / correct dtypes
    B, C, H, W = x_nchw.shape
    HW = H * W
    K, Fp = conv_w.shape
    Op = head_w.shape[1]

    patches = _im2col_3x3(x_nchw)                                 # (B, HW, K) bf16

    b_blk = _pick_b_block(B)
    hw_blk = _pick_hw_block(HW, b_blk, K * patches.dtype.itemsize,
                            max_rows=max_rows_per_block)
    grid = (B // b_blk, HW // hw_blk)

    kernel = functools.partial(_fused_kernel, inv_hw=1.0 / HW)

    return pl.pallas_call(
        kernel,
        out_shape=jax.ShapeDtypeStruct((B, Op), jnp.float32),
        grid_spec=pltpu.PrefetchScalarGridSpec(
            num_scalar_prefetch=0,
            grid=grid,
            in_specs=[
                pl.BlockSpec((b_blk, hw_blk, K), lambda b, s: (b, s, 0)),  # patches
                # Weights/biases: block index constant across the grid -> stay
                # resident in VMEM, no re-DMA per step.
                pl.BlockSpec((K, Fp), lambda b, s: (0, 0)),                # conv W
                pl.BlockSpec((1, Fp), lambda b, s: (0, 0)),                # conv b
                pl.BlockSpec((Fp, Op), lambda b, s: (0, 0)),               # heads W
                pl.BlockSpec((1, Op), lambda b, s: (0, 0)),                # heads b
            ],
            out_specs=pl.BlockSpec((b_blk, Op), lambda b, s: (b, 0)),
            scratch_shapes=[pltpu.VMEM((b_blk, Fp), jnp.float32)],         # accumulator
        ),
        compiler_params=pltpu.CompilerParams(
            dimension_semantics=("parallel", "arbitrary"),   # batch parallel, HW reduction
            vmem_limit_bytes=32 * 1024 * 1024,
        ),
    )(patches, conv_w, conv_b, head_w, head_b)


class MultiLabelModelPallas:
    """Pallas/JAX re-implementation of MultiLabelModel.forward."""

    def __init__(self, key, in_channels, basemodel_output, num_classes, binary_squeezed):
        self.num_classes = list(num_classes)
        self.binary_squeezed = binary_squeezed
        F = basemodel_output
        K = 9 * in_channels
        Fp = _round_up(max(F, 128), 128)
        k_cw, k_cb, k_hw, k_hb = jax.random.split(key, 4)

        conv_w = 0.1 * jax.random.normal(k_cw, (K, F), jnp.float32)
        conv_b = 0.1 * jax.random.normal(k_cb, (F,), jnp.float32)

        if binary_squeezed:
            O = len(self.num_classes)                 # nn.Linear(F, len(num_classes))
            head_w = 0.1 * jax.random.normal(k_hw, (F, O), jnp.float32)
            head_b = 0.1 * jax.random.normal(k_hb, (O,), jnp.float32)
            self.splits = None
        else:
            ws, bs = [], []                           # one nn.Linear(F, nc) per task, fused
            for i, nc in enumerate(self.num_classes):
                kw, kb = jax.random.split(jax.random.fold_in(k_hw, i))
                ws.append(0.1 * jax.random.normal(kw, (F, nc), jnp.float32))
                bs.append(0.1 * jax.random.normal(kb, (nc,), jnp.float32))
            head_w = jnp.concatenate(ws, axis=1)
            head_b = jnp.concatenate(bs, axis=0)
            offs = [0]
            for nc in self.num_classes:
                offs.append(offs[-1] + nc)
            self.splits = offs
            O = offs[-1]

        self.F, self.O = F, O
        Op = _round_up(max(O, 128), 128)

        # unpadded f32 copies for the pure-JAX reference
        self.conv_w_f32, self.conv_b_f32 = conv_w, conv_b
        self.head_w_f32, self.head_b_f32 = head_w, head_b

        # padded, lane-dense, MXU-friendly params (bf16 matmul operands, f32 biases)
        self.conv_w_p = jnp.zeros((K, Fp), jnp.bfloat16).at[:, :F].set(conv_w.astype(jnp.bfloat16))
        self.conv_b_p = jnp.zeros((1, Fp), jnp.float32).at[0, :F].set(conv_b)
        self.head_w_p = jnp.zeros((Fp, Op), jnp.bfloat16).at[:F, :O].set(head_w.astype(jnp.bfloat16))
        self.head_b_p = jnp.zeros((1, Op), jnp.float32).at[0, :O].set(head_b)

    def __call__(self, x_nchw, *, max_rows_per_block=1024):
        out_p = multilabel_forward(
            x_nchw,
            (self.conv_w_p, self.conv_b_p, self.head_w_p, self.head_b_p),
            max_rows_per_block=max_rows_per_block)
        out = out_p[:, :self.O]
        if self.binary_squeezed:
            return out
        return [out[:, self.splits[i]:self.splits[i + 1]]
                for i in range(len(self.num_classes))]


# ---------------------------------------------------------------------------
# Pure-JAX reference (mirrors the bf16 operand / f32 accumulation numerics)
# ---------------------------------------------------------------------------
def _reference(model, x_nchw):
    pat = _im2col_3x3(x_nchw)                                     # bf16 patches
    y = jnp.einsum("bpk,kf->bpf", pat, model.conv_w_f32.astype(jnp.bfloat16),
                   preferred_element_type=jnp.float32) + model.conv_b_f32
    feat = jnp.mean(jnp.maximum(y, 0.0), axis=1)
    out = jnp.dot(feat.astype(jnp.bfloat16), model.head_w_f32.astype(jnp.bfloat16),
                  preferred_element_type=jnp.float32) + model.head_b_f32
    if model.binary_squeezed:
        return out
    return [out[:, model.splits[i]:model.splits[i + 1]]
            for i in range(len(model.num_classes))]


if __name__ == "__main__":
    key = jax.random.PRNGKey(0)
    k_x, k_m1, k_m2 = jax.random.split(key, 3)

    B, C, H, W = 2, 4, 16, 16
    basemodel_output = 32
    num_classes = [3, 5, 7]

    x = jax.random.normal(k_x, (B, C, H, W), jnp.float32)

    # multi-head (binary_squeezed=False) variant: returns a list of per-task outputs
    model_multi = MultiLabelModelPallas(k_m1, C, basemodel_output, num_classes,
                                        binary_squeezed=False)
    refs = _reference(model_multi, x)

    # default tiling (largest spatial tile within the VMEM budget)
    outs = [jax.block_until_ready(o) for o in model_multi(x)]
    assert [o.shape for o in outs] == [(B, nc) for nc in num_classes]
    for o, r in zip(outs, refs):
        assert jnp.allclose(o, r, atol=2e-3, rtol=2e-3), "mismatch (multi-head)"

    # forced smaller spatial tile -> multi-step reduction grid (exercises the
    # @pl.when init / accumulate / finalize path)
    outs_small = [jax.block_until_ready(o)
                  for o in model_multi(x, max_rows_per_block=256)]
    for o, r in zip(outs_small, refs):
        assert jnp.allclose(o, r, atol=2e-3, rtol=2e-3), "mismatch (tiled reduction)"

    # squeezed (binary_squeezed=True) variant: single (B, len(num_classes)) output
    model_sq = MultiLabelModelPallas(k_m2, C, basemodel_output, num_classes,
                                     binary_squeezed=True)
    out_sq = jax.block_until_ready(model_sq(x))
    assert out_sq.shape == (B, len(num_classes))
    assert jnp.allclose(out_sq, _reference(model_sq, x), atol=2e-3, rtol=2e-3), \
        "mismatch (squeezed)"

    print("KERNEL_OK")
</pallas_src>

<mosaic_0001>
module attributes {stable_mosaic.version = 11 : i64} {
  func.func @_fused_kernel(%arg0: i32, %arg1: i32, %arg2: memref<2x256x36xbf16, #tpu.memory_space<vmem>>, %arg3: memref<36x128xbf16, #tpu.memory_space<vmem>>, %arg4: memref<1x128xf32, #tpu.memory_space<vmem>>, %arg5: memref<128x128xbf16, #tpu.memory_space<vmem>>, %arg6: memref<1x128xf32, #tpu.memory_space<vmem>>, %arg7: memref<2x128xf32, #tpu.memory_space<vmem>>, %arg8: memref<2x128xf32, #tpu.memory_space<vmem>>) attributes {dimension_semantics = [#tpu.dimension_semantics<parallel>, #tpu.dimension_semantics<arbitrary>], iteration_bounds = array<i64: 1, 1>, scalar_prefetch = 0 : i64, scratch_operands = 1 : i64, tpu.core_type = #tpu.core_type<tc>, window_params = [{transform_indices = @transform_0, window_bounds = array<i64: 2, 256, 36>}, {pipeline_mode = #tpu.pipeline_mode<synchronous>, transform_indices = @transform_1, window_bounds = array<i64: 36, 128>}, {pipeline_mode = #tpu.pipeline_mode<synchronous>, transform_indices = @transform_2, window_bounds = array<i64: 1, 128>}, {pipeline_mode = #tpu.pipeline_mode<synchronous>, transform_indices = @transform_3, window_bounds = array<i64: 128, 128>}, {pipeline_mode = #tpu.pipeline_mode<synchronous>, transform_indices = @transform_4, window_bounds = array<i64: 1, 128>}, {transform_indices = @transform_5, window_bounds = array<i64: 2, 128>}]} {
    %c0_i32 = arith.constant 0 : i32
    %0 = arith.cmpi eq, %arg1, %c0_i32 : i32
    %1 = arith.extui %0 : i1 to i32
    %c0_i32_0 = arith.constant 0 : i32
    %2 = arith.cmpi ne, %1, %c0_i32_0 : i32
    scf.if %2 {
      %cst_15 = arith.constant 0.000000e+00 : f32
      %20 = vector.broadcast %cst_15 : f32 to vector<2x128xf32>
      %c0_16 = arith.constant 0 : index
      %c0_17 = arith.constant 0 : index
      %21 = vector.load %arg8[%c0_16, %c0_17] : memref<2x128xf32, #tpu.memory_space<vmem>>, vector<2x128xf32>
      tpu.vector_store %arg8[%c0_16, %c0_17], %20 {strides = array<i32>} : memref<2x128xf32, #tpu.memory_space<vmem>>, vector<2x128xf32>,
    } else {
    }
    %c0 = arith.constant 0 : index
    %c0_1 = arith.constant 0 : index
    %c0_2 = arith.constant 0 : index
    %3 = vector.load %arg2[%c0, %c0_1, %c0_2] : memref<2x256x36xbf16, #tpu.memory_space<vmem>>, vector<2x256x36xbf16>
    %4 = vector.shape_cast %3 : vector<2x256x36xbf16> to vector<512x36xbf16>
    %c0_3 = arith.constant 0 : index
    %c0_4 = arith.constant 0 : index
    %5 = vector.load %arg3[%c0_3, %c0_4] : memref<36x128xbf16, #tpu.memory_space<vmem>>, vector<36x128xbf16>
    %cst = arith.constant dense<0.000000e+00> : vector<512x128xf32>
    %6 = tpu.matmul %4, %5, %cst {dimension_numbers = #tpu.dot_dimension_numbers<[1], [0], [0], [1], [0, 0, 1, 1], [], []>} : vector<512x36xbf16>, vector<36x128xbf16>, vector<512x128xf32> -> vector<512x128xf32>
    %c0_5 = arith.constant 0 : index
    %c0_6 = arith.constant 0 : index
    %7 = vector.load %arg4[%c0_5, %c0_6] : memref<1x128xf32, #tpu.memory_space<vmem>>, vector<1x128xf32>
    %8 = vector.broadcast %7 : vector<1x128xf32> to vector<512x128xf32>
    %9 = arith.addf %6, %8 : vector<512x128xf32>
    %cst_7 = arith.constant 0.000000e+00 : f32
    %10 = vector.broadcast %cst_7 : f32 to vector<512x128xf32>
    %11 = arith.maximumf %9, %10 : vector<512x128xf32>
    %c0_8 = arith.constant 0 : index
    %c0_9 = arith.constant 0 : index
    %12 = vector.load %arg8[%c0_8, %c0_9] : memref<2x128xf32, #tpu.memory_space<vmem>>, vector<2x128xf32>
    %13 = vector.shape_cast %11 : vector<512x128xf32> to vector<2x256x128xf32>
    %cst_10 = arith.constant dense<0.000000e+00> : vector<2x128xf32>
    %14 = vector.multi_reduction <add>, %13, %cst_10 [1] : vector<2x256x128xf32> to vector<2x128xf32>
    %15 = arith.addf %12, %14 : vector<2x128xf32>
    %c0_11 = arith.constant 0 : index
    %c0_12 = arith.constant 0 : index
    %16 = vector.load %arg8[%c0_11, %c0_12] : memref<2x128xf32, #tpu.memory_space<vmem>>, vector<2x128xf32>
    tpu.vector_store %arg8[%c0_11, %c0_12], %15 {strides = array<i32>} : memref<2x128xf32, #tpu.memory_space<vmem>>, vector<2x128xf32>,
    %c0_i32_13 = arith.constant 0 : i32
    %17 = arith.cmpi eq, %arg1, %c0_i32_13 : i32
    %18 = arith.extui %17 : i1 to i32
    %c0_i32_14 = arith.constant 0 : i32
    %19 = arith.cmpi ne, %18, %c0_i32_14 : i32
    scf.if %19 {
      %c0_15 = arith.constant 0 : index
      %c0_16 = arith.constant 0 : index
      %20 = vector.load %arg8[%c0_15, %c0_16] : memref<2x128xf32, #tpu.memory_space<vmem>>, vector<2x128xf32>
      %cst_17 = arith.constant 3.906250e-03 : f32
      %21 = vector.broadcast %cst_17 : f32 to vector<2x128xf32>
      %22 = arith.mulf %20, %21 : vector<2x128xf32>
      %23 = arith.truncf %22 : vector<2x128xf32> to vector<2x128xbf16>
      %c0_18 = arith.constant 0 : index
      %c0_19 = arith.constant 0 : index
      %24 = vector.load %arg5[%c0_18, %c0_19] : memref<128x128xbf16, #tpu.memory_space<vmem>>, vector<128x128xbf16>
      %cst_20 = arith.constant dense<0.000000e+00> : vector<2x128xf32>
      %25 = tpu.matmul %23, %24, %cst_20 {dimension_numbers = #tpu.dot_dimension_numbers<[1], [0], [0], [1], [0, 0, 1, 1], [], []>} : vector<2x128xbf16>, vector<128x128xbf16>, vector<2x128xf32> -> vector<2x128xf32>
      %c0_21 = arith.constant 0 : index
      %c0_22 = arith.constant 0 : index
      %26 = vector.load %arg6[%c0_21, %c0_22] : memref<1x128xf32, #tpu.memory_space<vmem>>, vector<1x128xf32>
      %27 = vector.broadcast %26 : vector<1x128xf32> to vector<2x128xf32>
      %28 = arith.addf %25, %27 : vector<2x128xf32>
      %c0_23 = arith.constant 0 : index
      %c0_24 = arith.constant 0 : index
      %29 = vector.load %arg7[%c0_23, %c0_24] : memref<2x128xf32, #tpu.memory_space<vmem>>, vector<2x128xf32>
      tpu.vector_store %arg7[%c0_23, %c0_24], %28 {strides = array<i32>} : memref<2x128xf32, #tpu.memory_space<vmem>>, vector<2x128xf32>,
    } else {
    }
    return
  }
  func.func @transform_0(%arg0: i32, %arg1: i32) -> (i32, i32, i32) {
    %c0_i32 = arith.constant 0 : i32
    %c0_i32_0 = arith.constant 0 : i32
    return %arg0, %arg1, %c0_i32 : i32, i32, i32
  }
  func.func @transform_1(%arg0: i32, %arg1: i32) -> (i32, i32) {
    %c0_i32 = arith.constant 0 : i32
    %c0_i32_0 = arith.constant 0 : i32
    %c0_i32_1 = arith.constant 0 : i32
    return %c0_i32, %c0_i32_0 : i32, i32
  }
  func.func @transform_2(%arg0: i32, %arg1: i32) -> (i32, i32) {
    %c0_i32 = arith.constant 0 : i32
    %c0_i32_0 = arith.constant 0 : i32
    %c0_i32_1 = arith.constant 0 : i32
    return %c0_i32, %c0_i32_0 : i32, i32
  }
  func.func @transform_3(%arg0: i32, %arg1: i32) -> (i32, i32) {
    %c0_i32 = arith.constant 0 : i32
    %c0_i32_0 = arith.constant 0 : i32
    %c0_i32_1 = arith.constant 0 : i32
    return %c0_i32, %c0_i32_0 : i32, i32
  }
  func.func @transform_4(%arg0: i32, %arg1: i32) -> (i32, i32) {
    %c0_i32 = arith.constant 0 : i32
    %c0_i32_0 = arith.constant 0 : i32
    %c0_i32_1 = arith.constant 0 : i32
    return %c0_i32, %c0_i32_0 : i32, i32
  }
  func.func @transform_5(%arg0: i32, %arg1: i32) -> (i32, i32) {
    %c0_i32 = arith.constant 0 : i32
    %c0_i32_0 = arith.constant 0 : i32
    return %arg0, %c0_i32 : i32, i32
  }
}

</mosaic_0001>

<bundles_post_ra>
// kernel: tpu_custom_call.1
= control target key start
LH: loop header
LB: loop body
LE: loop exit
PB: predicated region body
PF: predicated region fallthrough
CT: control target
= control target key end

     0   :  { %vm278_vm0 = vcmask 293888   ;;  %vm375_vm1 = vcmask 1041408   ;;  %s1611_s0 = inlined_call_operand.vmem [shape: bf16[2,256,36], index: 0, kind: input, shape index: {}]   ;;  %s1612_s1 = inlined_call_operand.vmem [shape: bf16[36,128], index: 1, kind: input, shape index: {}]   ;;  %s1613_s2 = inlined_call_operand.vmem [shape: f32[1,128], index: 2, kind: input, shape index: {}]   ;;  %s1614_s3 = inlined_call_operand.vmem [shape: bf16[128,128], index: 3, kind: input, shape index: {}]   ;;  %s1615_s4 = inlined_call_operand.vmem [shape: f32[1,128], index: 4, kind: input, shape index: {}]   ;;  %s1616_s5 = inlined_call_operand.hbm [shape: f32[2,128], index: 5, kind: output, shape index: {}]  }
   0x1   :  { %v1168_v0 = vld [vmem:[%s1612_s1] sm:$0xff]   ;;  %v1169_v1 = vld [vmem:[%s1612_s1 + $0x8] sm:$0xff]   ;;  %v1170_v2 = vld [vmem:[%s1612_s1 + $0x10] ss:$0 sps:$4 sm:$0x33]  }
   0x2   :  { %1067 = vmatprep.subr.bf16.mxu0 %v1168_v0  ;;  %v1171_v3 = vld [vmem:[%s1611_s0] sm:$0xff]   ;;  %1157 = vmatprep.subr.bf16.mxu1 %v1168_v0  ;;  %v377_v4 = vsel %vm375_vm1, %v1170_v2, 0  ;;  %v1172_v5 = vld [vmem:[%s1611_s0 + $0x8] sm:$0xff]   ;;  %v1173_v6 = vld [vmem:[%s1611_s0 + $0x10] sm:$0xff]  }
   0x3   :  { %1068 = vmatpush3.bf16.msra.mxu0 %v1168_v0  ;;  %1160 = vmatpush3.bf16.msra.mxu1 %v1168_v0  ;;  %v1174_v7 = vld [vmem:[%s1611_s0 + $0x18] sm:$0xff]   ;;  %v1175_v8 = vld [vmem:[%s1611_s0 + $0x20] sm:$0xff]   ;;  %v1189_v9 = vld [vmem:[%s1611_s0 + $0x90] sm:$0xff]  }
   0x4   :  { %1069 = vmatprep.subr.bf16.mxu0 %v1169_v1  ;;  %1073 = vmatprep.mubr.msk.bf16.mxu0 %vm278_vm0, %v1171_v3  ;;  %v1190_v10 = vld [vmem:[%s1611_s0 + $0x98] sm:$0xff]   ;;  %v1191_v11 = vld [vmem:[%s1611_s0 + $0xa0] sm:$0xff]   ;;  %v1176_v12 = vld [vmem:[%s1611_s0 + $0x28] sm:$0xff]  }
   0x5   :  { %1158 = vmatprep.subr.bf16.mxu1 %v1169_v1  ;;  %1109 = vmatprep.mubr.msk.bf16.mxu1 %vm278_vm0, %v1189_v9  ;;  %v1177_v13 = vld [vmem:[%s1611_s0 + $0x30] sm:$0xff]   ;;  %v1192_v14 = vld [vmem:[%s1611_s0 + $0xa8] sm:$0xff]   ;;  %v1178_v16 = vld [vmem:[%s1611_s0 + $0x38] sm:$0xff]  }
   0x6   :  { %v1193_v15 = vld [vmem:[%s1611_s0 + $0xb0] sm:$0xff]   ;;  %v1179_v17 = vld [vmem:[%s1611_s0 + $0x40] sm:$0xff]   ;;  %v1194_v18 = vld [vmem:[%s1611_s0 + $0xb8] sm:$0xff]  }
   0x7   :  { %1070 = vmatpush3.bf16.msra.mxu0 %v1169_v1  ;;  %1161 = vmatpush3.bf16.msra.mxu1 %v1169_v1  ;;  %v1195_v19 = vld [vmem:[%s1611_s0 + $0xc0] sm:$0xff]  }
   0x8   :  { %1163 = vmatprep.subr.msk.bf16.mxu0 %vm375_vm1, %v1170_v2  ;;  %1164 = vmatprep.subr.msk.bf16.mxu1 %vm375_vm1, %v1170_v2 }
   0xb   :  { %1072 = vmatpush3.bf16.msra.mxu0 %v377_v4  ;;  %1162 = vmatpush3.bf16.msra.mxu1 %v377_v4 }
   0xe   :  { %1074 = vmatmul.mubr.msk.bf16.vlgmr.msra.gmra.mrb[0].mxu0 %vm278_vm0, %v1172_v5  ;;  %1110 = vmatmul.mubr.msk.bf16.vlgmr.msra.gmra.mrb[0].mxu1 %vm278_vm0, %v1190_v10 }
   0xf   :  { %1077 = vmatprep.mubr.msk.bf16.mxu0 %vm278_vm0, %v1173_v6  ;;  %1113 = vmatprep.mubr.msk.bf16.mxu1 %vm278_vm0, %v1191_v11 }
  0x16   :  { %1078 = vmatmul.mubr.msk.bf16.gmra.mrb[4].mxu0 %vm278_vm0, %v1174_v7  ;;  %1114 = vmatmul.mubr.msk.bf16.gmra.mrb[4].mxu1 %vm278_vm0, %v1192_v14 }
  0x17   :  { %1081 = vmatprep.mubr.msk.bf16.mxu0 %vm278_vm0, %v1175_v8  ;;  %1117 = vmatprep.mubr.msk.bf16.mxu1 %vm278_vm0, %v1193_v15 }
  0x1e   :  { %1082 = vmatmul.mubr.msk.bf16.gmra.mrb[8].mxu0 %vm278_vm0, %v1176_v12  ;;  %1118 = vmatmul.mubr.msk.bf16.gmra.mrb[8].mxu1 %vm278_vm0, %v1194_v18 }
  0x1f   :  { %1085 = vmatprep.mubr.msk.bf16.mxu0 %vm278_vm0, %v1177_v13 }
  0x26   :  { %1086 = vmatmul.mubr.msk.bf16.gmra.mrb[12].mxu0 %vm278_vm0, %v1178_v16 }
  0x27   :  { %1089 = vmatprep.mubr.msk.bf16.mxu0 %vm278_vm0, %v1179_v17 }
  0x28   :  { %10 = vsyncpa [#allocation4], 0  ;;  %1121 = vmatprep.mubr.msk.bf16.mxu1 %vm278_vm0, %v1195_v19  ;;  %v1180_v20 = vld [vmem:[%s1611_s0 + $0x48] sm:$0xff]   ;;  %v1181_v21 = vld [vmem:[%s1611_s0 + $0x50] sm:$0xff]   ;;  %v1235_v37 = vmov 0.0   ;;  %vm1236_vm2 = vmmov 0  }
  0x29   :  { %v1196_v22 = vld [vmem:[%s1611_s0 + $0xc8] sm:$0xff]   ;;  %v1197_v23 = vld [vmem:[%s1611_s0 + $0xd0] sm:$0xff]   ;;  %v1182_v24 = vld [vmem:[%s1611_s0 + $0x58] sm:$0xff]   ;;  %1137 = vmatprep.subr.bf16.mxu1 %v1235_v37  ;;  %26 = vst [vmem:[#allocation2] sm:$0x3] %v1235_v37  ;;  %vm809_vm3 = vcmask 1041409  }
  0x2a   :  { %1122 = vmatmul.mubr.msk.bf16.gmra.mrb[12].mxu1 %vm278_vm0, %v1196_v22  ;;  %v1183_v25 = vld [vmem:[%s1611_s0 + $0x60] sm:$0xff]   ;;  %v1198_v26 = vld [vmem:[%s1611_s0 + $0xd8] sm:$0xff]   ;;  %v1184_v28 = vld [vmem:[%s1611_s0 + $0x68] sm:$0xff]   ;;  %s1237_s27 = smov [#allocation3]  }
  0x2b   :  { %1125 = vmatprep.mubr.msk.bf16.mxu1 %vm278_vm0, %v1197_v23  ;;  %v1199_v27 = vld [vmem:[%s1611_s0 + $0xe0] sm:$0xff]   ;;  %v1185_v29 = vld [vmem:[%s1611_s0 + $0x70] sm:$0xff]   ;;  %v1200_v30 = vld [vmem:[%s1611_s0 + $0xe8] sm:$0xff]   ;;  %s938_s1 = sshll.u32 %s1237_s27, 4  ;;  %s939_s1 = int_to_ptr.vmem [resolvable:$true] %s938_s1 }
  0x2c   :  { %v1201_v31 = vld [vmem:[%s1611_s0 + $0xf0] sm:$0xff]   ;;  %v1186_v32 = vld [vmem:[%s1611_s0 + $0x78] sm:$0xff]   ;;  %v1187_v33 = vld [vmem:[%s1611_s0 + $0x80] sm:$0xff]   ;;  %s1211_s28 = scalar_lea.vmem %s939_s1, 32  ;;  %p1216_p1 = scmp.lt.s32.totalorder %s939_s1, %s939_s1 }
  0x2d   :  { %v1202_v34 = vld [vmem:[%s1611_s0 + $0xf8] sm:$0xff]   ;;  %v1188_v35 = vld [vmem:[%s1611_s0 + $0x88] sm:$0xff]   ;;  %v1203_v36 = vld [vmem:[%s1614_s3] sm:$0xff]   ;;  %p1212_p0 = scmp.ne.s32.totalorder %s939_s1, %s1211_s28  ;;  %p1217_p2 = scmp.lt.s32.totalorder %s1211_s28, %s1211_s28 }
  0x2e   :  { %1090 = vmatmul.mubr.msk.bf16.gmra.mrb[16].mxu0 %vm278_vm0, %v1180_v20  ;;  %1138 = vmatpush3.bf16.msra.mxu1 %v1203_v36  ;;  %v1204_v38 = vld [vmem:[%s1614_s3 + $0x8] sm:$0xff]   ;;  %v1205_v39 = vld [vmem:[%s1614_s3 + $0x10] sm:$0xff]   ;;  %v1421_v40 = vld [vmem:[%s1613_s2] ss:$0 sm:$0xff] }
  0x2f   :  { %1093 = vmatprep.mubr.msk.bf16.mxu0 %vm278_vm0, %v1181_v21  ;;  %1139 = vmatprep.subr.bf16.mxu1 %v1235_v37  ;;  %v1206_v3 = vld [vmem:[%s1614_s3 + $0x18] sm:$0xff]   ;;  %v1207_v11 = vld [vmem:[%s1614_s3 + $0x20] sm:$0xff]   ;;  %p1218_p3 = por %p1217_p2, %p1216_p1 }
  0x31   :  { %p1219_p4 = pnand %p1218_p3, %p1212_p0 }
  0x32   :  { %1126 = vmatmul.mubr.msk.bf16.gmra.mrb[16].mxu1 %vm278_vm0, %v1198_v26 }
  0x33   :  { %1129 = vmatprep.mubr.msk.bf16.mxu1 %vm278_vm0, %v1199_v27  ;;  %1140 = vmatpush3.bf16.msra.mxu1 %v1204_v38 }
  0x34   :  { %1141 = vmatprep.subr.bf16.mxu1 %v1235_v37 }
  0x36   :  { %1094 = vmatmul.mubr.msk.bf16.gmra.mrb[20].mxu0 %vm278_vm0, %v1182_v24 }
  0x37   :  { %1097 = vmatprep.mubr.msk.bf16.mxu0 %vm278_vm0, %v1183_v25  ;;  %1142 = vmatpush3.bf16.msra.mxu1 %v1205_v39  ;;  %v1208_v25 = vld [vmem:[%s1614_s3 + $0x28] sm:$0xff]  }
  0x38   :  { %1143 = vmatprep.subr.bf16.mxu1 %v1235_v37 }
  0x3a   :  { %1130 = vmatmul.mubr.msk.bf16.gmra.mrb[20].mxu1 %vm278_vm0, %v1200_v30  ;;  %v1209_v30 = vld [vmem:[%s1614_s3 + $0x30] sm:$0xff]  }
  0x3b   :  { %1133 = vmatprep.mubr.msk.bf16.mxu1 %vm278_vm0, %v1201_v31  ;;  %1144 = vmatpush3.bf16.msra.mxu1 %v1206_v3 }
  0x3c   :  { %1145 = vmatprep.subr.bf16.mxu1 %v1235_v37 }
  0x3e   :  { %1098 = vmatmul.mubr.msk.bf16.gmra.mrb[24].mxu0 %vm278_vm0, %v1184_v28 }
  0x3f   :  { %1101 = vmatprep.mubr.msk.bf16.mxu0 %vm278_vm0, %v1185_v29  ;;  %1146 = vmatpush3.bf16.msra.mxu1 %v1207_v11 }
  0x40   :  { %1147 = vmatprep.subr.bf16.mxu1 %v1235_v37 }
  0x42   :  { %1134 = vmatmul.mubr.msk.bf16.gmra.mrb[24].mxu1 %vm278_vm0, %v1202_v34 }
  0x43   :  { %1148 = vmatpush3.bf16.msra.mxu1 %v1208_v25  ;;  %1153 = vmatprep.mubr.msk.bf16.mxu1 %vm1236_vm2, %v1235_v37 }
  0x44   :  { %1149 = vmatprep.subr.bf16.mxu1 %v1235_v37 }
  0x46   :  { %1102 = vmatmul.mubr.msk.bf16.gmra.mrb[28].mxu0 %vm278_vm0, %v1186_v32 }
  0x47   :  { %1105 = vmatprep.mubr.msk.bf16.mxu0 %vm278_vm0, %v1187_v33  ;;  %1150 = vmatpush3.bf16.msra.mxu1 %v1209_v30 }
  0x48   :  { %1151 = vmatprep.subr.bf16.mxu1 %v1235_v37 }
  0x4e   :  { %1106 = vmatmul.mubr.msk.bf16.gmra.mrb[32].mxu0 %vm278_vm0, %v1188_v35 }
  0xe1   :  { %v1075_v41 = vpop.f32.mrb[0].mxu0  ;;  %v1429_v59 = vpop.f32.mrb[0].mxu1 }
  0xe2   :  { %v413_v42 = vpop.f32.mrb[1].mxu0  ;;  %v422_v46 = vadd.f32 %v1075_v41, %v1421_v40  ;;  %v1431_v61 = vpop.f32.mrb[1].mxu1 }
  0xe3   :  { %v414_v43 = vadd.f32 %v1421_v40, %v413_v42  ;;  %v1076_v44 = vpop.f32.mrb[2].mxu0  ;;  %v1435_v2 = vpop.f32.mrb[2].mxu1  ;;  %v1210_v42 = vld [vmem:[%s1614_s3 + $0x38] sm:$0xff]  }
  0xe4   :  { %v416_v45 = vpop.f32.mrb[3].mxu0  ;;  %v425_v49 = vadd.f32 %v1076_v44, %v1421_v40  ;;  %v670_v51 = vmax.f32 %v422_v46, 0.0  ;;  %v1440_v4 = vpop.f32.mrb[3].mxu1  ;;  %1152 = vmatpush3.bf16.msra.mxu1 %v1210_v42 }
  0xe5   :  { %v417_v47 = vadd.f32 %v1421_v40, %v416_v45  ;;  %v668_v48 = vmax.f32 %v414_v43, 0.0 }
  0xe6   :  { %v671_v55 = vmax.f32 %v425_v49, 0.0 }
  0xe7   :  { %v669_v50 = vmax.f32 %v417_v47, 0.0 }
  0xe9   :  { %v733_v52 = vadd.f32 %v669_v50, %v668_v48  ;;  %v1079_v53 = vpop.f32.mrb[4].mxu0  ;;  %v1448_v17 = vpop.f32.mrb[4].mxu1 }
  0xea   :  { %v429_v54 = vpop.f32.mrb[5].mxu0  ;;  %v438_v62 = vadd.f32 %v1079_v53, %v1421_v40  ;;  %v1450_v19 = vpop.f32.mrb[5].mxu1 }
  0xeb   :  { %v734_v56 = vadd.f32 %v733_v52, %v670_v51  ;;  %v430_v57 = vadd.f32 %v1421_v40, %v429_v54  ;;  %v1080_v58 = vpop.f32.mrb[6].mxu0  ;;  %v1455_v24 = vpop.f32.mrb[6].mxu1 }
  0xec   :  { %v432_v60 = vpop.f32.mrb[7].mxu0  ;;  %v441_v6 = vadd.f32 %v1080_v58, %v1421_v40  ;;  %v674_v8 = vmax.f32 %v438_v62, 0.0  ;;  %v1460_v26 = vpop.f32.mrb[7].mxu1 }
  0xed   :  { %v672_v63 = vmax.f32 %v430_v57, 0.0  ;;  %v735_v0 = vadd.f32 %v734_v56, %v671_v55  ;;  %v433_v1 = vadd.f32 %v1421_v40, %v432_v60 }
  0xee   :  { %v675_v13 = vmax.f32 %v441_v6, 0.0 }
  0xef   :  { %v736_v5 = vadd.f32 %v735_v0, %v672_v63  ;;  %v673_v7 = vmax.f32 %v433_v1, 0.0 }
  0xf1   :  { %v737_v9 = vadd.f32 %v736_v5, %v673_v7  ;;  %v1083_v10 = vpop.f32.mrb[8].mxu0  ;;  %v1469_v41 = vpop.f32.mrb[8].mxu1 }
  0xf2   :  { %v445_v12 = vpop.f32.mrb[9].mxu0  ;;  %v454_v20 = vadd.f32 %v1083_v10, %v1421_v40  ;;  %v1474_v44 = vpop.f32.mrb[9].mxu1 }
  0xf3   :  { %v738_v14 = vadd.f32 %v737_v9, %v674_v8  ;;  %v446_v15 = vadd.f32 %v1421_v40, %v445_v12  ;;  %v1084_v16 = vpop.f32.mrb[10].mxu0  ;;  %v1479_v49 = vpop.f32.mrb[10].mxu1 }
  0xf4   :  { %v448_v18 = vpop.f32.mrb[11].mxu0  ;;  %v457_v28 = vadd.f32 %v1084_v16, %v1421_v40  ;;  %v678_v31 = vmax.f32 %v454_v20, 0.0  ;;  %v1481_v50 = vpop.f32.mrb[11].mxu1 }
  0xf5   :  { %v676_v21 = vmax.f32 %v446_v15, 0.0  ;;  %v739_v22 = vadd.f32 %v738_v14, %v675_v13  ;;  %v449_v23 = vadd.f32 %v1421_v40, %v448_v18 }
  0xf6   :  { %v679_v35 = vmax.f32 %v457_v28, 0.0 }
  0xf7   :  { %v740_v27 = vadd.f32 %v739_v22, %v676_v21  ;;  %v677_v29 = vmax.f32 %v449_v23, 0.0 }
  0xf9   :  { %v741_v32 = vadd.f32 %v740_v27, %v677_v29  ;;  %v1087_v33 = vpop.f32.mrb[12].mxu0 }
  0xfa   :  { %v461_v34 = vpop.f32.mrb[13].mxu0  ;;  %v470_v45 = vadd.f32 %v1087_v33, %v1421_v40 }
  0xfb   :  { %v742_v36 = vadd.f32 %v741_v32, %v678_v31  ;;  %v462_v38 = vadd.f32 %v1421_v40, %v461_v34  ;;  %v1088_v39 = vpop.f32.mrb[14].mxu0 }
  0xfc   :  { %v464_v43 = vpop.f32.mrb[15].mxu0  ;;  %v473_v52 = vadd.f32 %v1088_v39, %v1421_v40  ;;  %v682_v54 = vmax.f32 %v470_v45, 0.0 }
  0xfd   :  { %v680_v46 = vmax.f32 %v462_v38, 0.0  ;;  %v743_v47 = vadd.f32 %v742_v36, %v679_v35  ;;  %v465_v48 = vadd.f32 %v1421_v40, %v464_v43  ;;  %v1485_v63 = vpop.f32.mrb[12].mxu1 }
  0xfe   :  { %v683_v37 = vmax.f32 %v473_v52, 0.0  ;;  %v1487_v1 = vpop.f32.mrb[13].mxu1 }
  0xff   :  { %v744_v51 = vadd.f32 %v743_v47, %v680_v46  ;;  %v681_v53 = vmax.f32 %v465_v48, 0.0  ;;  %v1491_v8 = vpop.f32.mrb[14].mxu1 }
 0x100   :  { %v1493_v9 = vpop.f32.mrb[15].mxu1 }
 0x101   :  { %v745_v55 = vadd.f32 %v744_v51, %v681_v53  ;;  %v1091_v56 = vpop.f32.mrb[16].mxu0 }
 0x102   :  { %v477_v57 = vpop.f32.mrb[17].mxu0  ;;  %v486_v3 = vadd.f32 %v1091_v56, %v1421_v40 }
 0x103   :  { %v746_v58 = vadd.f32 %v745_v55, %v682_v54  ;;  %v478_v60 = vadd.f32 %v1421_v40, %v477_v57  ;;  %v1092_v62 = vpop.f32.mrb[18].mxu0 }
 0x104   :  { %v480_v0 = vpop.f32.mrb[19].mxu0  ;;  %v489_v11 = vadd.f32 %v1092_v62, %v1421_v40  ;;  %v686_v13 = vmax.f32 %v486_v3, 0.0 }
 0x105   :  { %v684_v5 = vmax.f32 %v478_v60, 0.0  ;;  %v747_v6 = vadd.f32 %v746_v58, %v683_v37  ;;  %v481_v7 = vadd.f32 %v1421_v40, %v480_v0  ;;  %v1497_v23 = vpop.f32.mrb[16].mxu1 }
 0x106   :  { %v687_v18 = vmax.f32 %v489_v11, 0.0  ;;  %v1499_v27 = vpop.f32.mrb[17].mxu1 }
 0x107   :  { %v748_v10 = vadd.f32 %v747_v6, %v684_v5  ;;  %v685_v12 = vmax.f32 %v481_v7, 0.0  ;;  %v1503_v32 = vpop.f32.mrb[18].mxu1 }
 0x108   :  { %v1505_v33 = vpop.f32.mrb[19].mxu1 }
 0x109   :  { %v749_v14 = vadd.f32 %v748_v10, %v685_v12  ;;  %v1095_v15 = vpop.f32.mrb[20].mxu0 }
 0x10a   :  { %v493_v16 = vpop.f32.mrb[21].mxu0  ;;  %v502_v28 = vadd.f32 %v1095_v15, %v1421_v40 }
 0x10b   :  { %v750_v20 = vadd.f32 %v749_v14, %v686_v13  ;;  %v494_v21 = vadd.f32 %v1421_v40, %v493_v16  ;;  %v1096_v22 = vpop.f32.mrb[22].mxu0 }
 0x10c   :  { %v496_v25 = vpop.f32.mrb[23].mxu0  ;;  %v505_v35 = vadd.f32 %v1096_v22, %v1421_v40  ;;  %v690_v38 = vmax.f32 %v502_v28, 0.0 }
 0x10d   :  { %v688_v29 = vmax.f32 %v494_v21, 0.0  ;;  %v751_v30 = vadd.f32 %v750_v20, %v687_v18  ;;  %v497_v31 = vadd.f32 %v1421_v40, %v496_v25  ;;  %v1509_v51 = vpop.f32.mrb[20].mxu1 }
 0x10e   :  { %v691_v45 = vmax.f32 %v505_v35, 0.0  ;;  %v1511_v53 = vpop.f32.mrb[21].mxu1 }
 0x10f   :  { %v752_v34 = vadd.f32 %v751_v30, %v688_v29  ;;  %v689_v36 = vmax.f32 %v497_v31, 0.0  ;;  %v1515_v37 = vpop.f32.mrb[22].mxu1 }
 0x110   :  { %v1517_v58 = vpop.f32.mrb[23].mxu1 }
 0x111   :  { %v753_v39 = vadd.f32 %v752_v34, %v689_v36  ;;  %v1099_v42 = vpop.f32.mrb[24].mxu0 }
 0x112   :  { %v509_v43 = vpop.f32.mrb[25].mxu0  ;;  %v518_v54 = vadd.f32 %v1099_v42, %v1421_v40 }
 0x113   :  { %v754_v46 = vadd.f32 %v753_v39, %v690_v38  ;;  %v510_v47 = vadd.f32 %v1421_v40, %v509_v43  ;;  %v1100_v48 = vpop.f32.mrb[26].mxu0 }
 0x114   :  { %v512_v52 = vpop.f32.mrb[27].mxu0  ;;  %v521_v62 = vadd.f32 %v1100_v48, %v1421_v40  ;;  %v694_v3 = vmax.f32 %v518_v54, 0.0 }
 0x115   :  { %v692_v55 = vmax.f32 %v510_v47, 0.0  ;;  %v755_v56 = vadd.f32 %v754_v46, %v691_v45  ;;  %v513_v57 = vadd.f32 %v1421_v40, %v512_v52  ;;  %v1521_v14 = vpop.f32.mrb[24].mxu1 }
 0x116   :  { %v695_v10 = vmax.f32 %v521_v62, 0.0  ;;  %v1523_v16 = vpop.f32.mrb[25].mxu1 }
 0x117   :  { %v756_v60 = vadd.f32 %v755_v56, %v692_v55  ;;  %v693_v0 = vmax.f32 %v513_v57, 0.0  ;;  %v1527_v25 = vpop.f32.mrb[26].mxu1  ;;  %v558_v57 = vadd.f32 %v1421_v40, %v1431_v61  ;;  %v574_v61 = vadd.f32 %v1421_v40, %v1450_v19 }
 0x118   :  { %v1529_v28 = vpop.f32.mrb[27].mxu1  ;;  %v590_v19 = vadd.f32 %v1421_v40, %v1474_v44  ;;  %v606_v44 = vadd.f32 %v1421_v40, %v1487_v1  ;;  %v622_v1 = vadd.f32 %v1421_v40, %v1499_v27  ;;  %v638_v27 = vadd.f32 %v1421_v40, %v1511_v53 }
 0x119   :  { %v757_v5 = vadd.f32 %v756_v60, %v693_v0  ;;  %v1103_v6 = vpop.f32.mrb[28].mxu0  ;;  %v654_v53 = vadd.f32 %v1421_v40, %v1523_v16 }
 0x11a   :  { %v525_v7 = vpop.f32.mrb[29].mxu0  ;;  %v534_v18 = vadd.f32 %v1103_v6, %v1421_v40  ;;  %v561_v6 = vadd.f32 %v1421_v40, %v1440_v4  ;;  %v577_v4 = vadd.f32 %v1421_v40, %v1460_v26  ;;  %v593_v26 = vadd.f32 %v1421_v40, %v1481_v50 }
 0x11b   :  { %v758_v11 = vadd.f32 %v757_v5, %v694_v3  ;;  %v526_v12 = vadd.f32 %v1421_v40, %v525_v7  ;;  %v1104_v13 = vpop.f32.mrb[30].mxu0  ;;  %v704_v5 = vmax.f32 %v558_v57, 0.0  ;;  %v566_v7 = vadd.f32 %v1429_v59, %v1421_v40 }
 0x11c   :  { %v528_v15 = vpop.f32.mrb[31].mxu0  ;;  %v537_v30 = vadd.f32 %v1104_v13, %v1421_v40  ;;  %v698_v34 = vmax.f32 %v534_v18, 0.0  ;;  %v705_v13 = vmax.f32 %v561_v6, 0.0  ;;  %v582_v59 = vadd.f32 %v1448_v17, %v1421_v40 }
 0x11d   :  { %v696_v20 = vmax.f32 %v526_v12, 0.0  ;;  %v759_v21 = vadd.f32 %v758_v11, %v695_v10  ;;  %v529_v22 = vadd.f32 %v1421_v40, %v528_v15  ;;  %v569_v12 = vadd.f32 %v1435_v2, %v1421_v40 }
 0x11e   :  { %v699_v39 = vmax.f32 %v537_v30, 0.0  ;;  %v706_v15 = vmax.f32 %v566_v7, 0.0  ;;  %v585_v2 = vadd.f32 %v1455_v24, %v1421_v40  ;;  %v598_v17 = vadd.f32 %v1469_v41, %v1421_v40 }
 0x11f   :  { %v760_v29 = vadd.f32 %v759_v21, %v696_v20  ;;  %v697_v31 = vmax.f32 %v529_v22, 0.0  ;;  %v707_v20 = vmax.f32 %v569_v12, 0.0  ;;  %v708_v22 = vmax.f32 %v574_v61, 0.0 }
 0x120   :  { %v601_v24 = vadd.f32 %v1479_v49, %v1421_v40  ;;  %v609_v50 = vadd.f32 %v1421_v40, %v1493_v9  ;;  %v614_v41 = vadd.f32 %v1485_v63, %v1421_v40  ;;  %v617_v49 = vadd.f32 %v1491_v8, %v1421_v40 }
 0x121   :  { %v761_v35 = vadd.f32 %v760_v29, %v697_v31  ;;  %v1107_v36 = vpop.f32.mrb[32].mxu0  ;;  %v709_v31 = vmax.f32 %v577_v4, 0.0  ;;  %v720_v6 = vmax.f32 %v622_v1, 0.0  ;;  %v625_v9 = vadd.f32 %v1421_v40, %v1505_v33 }
 0x122   :  { %v541_v38 = vpop.f32.mrb[33].mxu0  ;;  %v550_v48 = vadd.f32 %v1107_v36, %v1421_v40  ;;  %v711_v36 = vmax.f32 %v585_v2, 0.0  ;;  %v630_v63 = vadd.f32 %v1497_v23, %v1421_v40  ;;  %v633_v8 = vadd.f32 %v1503_v32, %v1421_v40 }
 0x123   :  { %v762_v42 = vadd.f32 %v761_v35, %v698_v34  ;;  %v542_v43 = vadd.f32 %v1421_v40, %v541_v38  ;;  %v1108_v45 = vpop.f32.mrb[34].mxu0  ;;  %v710_v34 = vmax.f32 %v582_v59, 0.0  ;;  %v641_v33 = vadd.f32 %v1421_v40, %v1517_v58 }
 0x124   :  { %v544_v46 = vpop.f32.mrb[35].mxu0  ;;  %v553_v55 = vadd.f32 %v1108_v45, %v1421_v40  ;;  %v702_v60 = vmax.f32 %v550_v48, 0.0  ;;  %v713_v45 = vmax.f32 %v593_v26, 0.0  ;;  %v722_v12 = vmax.f32 %v630_v63, 0.0 }
 0x125   :  { %v1533_v47 = vadd.f32 %v762_v42, %v699_v39  ;;  %v545_v52 = vadd.f32 %v1421_v40, %v544_v46  ;;  %v700_v54 = vmax.f32 %v542_v43, 0.0  ;;  %v712_v39 = vmax.f32 %v590_v19, 0.0 }
 0x126   :  { %v703_v0 = vmax.f32 %v553_v55, 0.0  ;;  %v714_v46 = vmax.f32 %v598_v17, 0.0  ;;  %v716_v55 = vmax.f32 %v606_v44, 0.0  ;;  %v723_v61 = vmax.f32 %v633_v8, 0.0 }
 0x127   :  { %v701_v56 = vmax.f32 %v545_v52, 0.0  ;;  %v715_v52 = vmax.f32 %v601_v24, 0.0  ;;  %v646_v23 = vadd.f32 %v1509_v51, %v1421_v40  ;;  %v649_v32 = vadd.f32 %v1515_v37, %v1421_v40 }
 0x128   :  { %v728_v2 = vmax.f32 %v654_v53, 0.0  ;;  %v657_v58 = vadd.f32 %v1421_v40, %v1529_v28  ;;  %v662_v51 = vadd.f32 %v1521_v14, %v1421_v40  ;;  %v665_v37 = vadd.f32 %v1527_v25, %v1421_v40 }
 0x129   :  { %v770_v62 = vadd.f32 %v701_v56, %v700_v54  ;;  %v726_v4 = vmax.f32 %v646_v23, 0.0 }
 0x12b   :  { %v771_v3 = vadd.f32 %v770_v62, %v702_v60  ;;  %v717_v60 = vmax.f32 %v609_v50, 0.0  ;;  %v718_v62 = vmax.f32 %v614_v41, 0.0  ;;  %v1014_v41 = vld [vmem:[%s1615_s4] ss:$0 sm:$0xff] }
 0x12d   :  { %v772_v10 = vadd.f32 %v771_v3, %v703_v0  ;;  %v719_v3 = vmax.f32 %v617_v49, 0.0 }
 0x12f   :  { %v773_v11 = vadd.f32 %v772_v10, %v704_v5 }
 0x131   :  { %v774_v18 = vadd.f32 %v773_v11, %v705_v13  ;;  %v721_v11 = vmax.f32 %v625_v9, 0.0 }
 0x133   :  { %v775_v21 = vadd.f32 %v774_v18, %v706_v15  ;;  %v724_v18 = vmax.f32 %v638_v27, 0.0 }
 0x135   :  { %v776_v29 = vadd.f32 %v775_v21, %v707_v20 }
 0x137   :  { %v777_v30 = vadd.f32 %v776_v29, %v708_v22  ;;  %v725_v22 = vmax.f32 %v641_v33, 0.0  ;;  %v727_v29 = vmax.f32 %v649_v32, 0.0 }
 0x139   :  { %v778_v35 = vadd.f32 %v777_v30, %v709_v31  ;;  %v764_v31 = vrot.slane %v1533_v47, 4 }
 0x13b   :  { %v779_v38 = vadd.f32 %v778_v35, %v710_v34  ;;  %v729_v35 = vmax.f32 %v657_v58, 0.0  ;;  %v765_v16 = vadd.f32 %v764_v31, %v1533_v47 }
 0x13d   :  { %v780_v42 = vadd.f32 %v779_v38, %v711_v36  ;;  %v730_v36 = vmax.f32 %v662_v51, 0.0  ;;  %v766_v17 = vrot.slane %v765_v16, 2 }
 0x13f   :  { %v781_v43 = vadd.f32 %v780_v42, %v712_v39  ;;  %v731_v39 = vmax.f32 %v665_v37, 0.0 }
 0x141   :  { %v782_v48 = vadd.f32 %v781_v43, %v713_v45  ;;  %v767_v43 = vadd.f32 %v766_v17, %v765_v16 }
 0x143   :  { %v783_v54 = vadd.f32 %v782_v48, %v714_v46  ;;  %v768_v44 = vrot.slane %v767_v43, 1 }
 0x145   :  { %v784_v56 = vadd.f32 %v783_v54, %v715_v52  ;;  %v769_v48 = vadd.f32 %v768_v44, %v767_v43  ;;  %v732_v52 = vld [vmem:[#allocation2] sm:$0x3] }
 0x147   :  { %v785_v57 = vadd.f32 %v784_v56, %v716_v55 }
 0x149   :  { %v786_v0 = vadd.f32 %v785_v57, %v717_v60 }
 0x14b   :  { %v787_v5 = vadd.f32 %v786_v0, %v718_v62 }
 0x14d   :  { %v788_v7 = vadd.f32 %v787_v5, %v719_v3 }
 0x14f   :  { %v789_v10 = vadd.f32 %v788_v7, %v720_v6 }
 0x151   :  { %v790_v13 = vadd.f32 %v789_v10, %v721_v11 }
 0x153   :  { %v791_v15 = vadd.f32 %v790_v13, %v722_v12 }
 0x155   :  { %v792_v20 = vadd.f32 %v791_v15, %v723_v61 }
 0x157   :  { %v793_v21 = vadd.f32 %v792_v20, %v724_v18 }
 0x159   :  { %v794_v59 = vadd.f32 %v793_v21, %v725_v22 }
 0x15b   :  { %v795_v30 = vadd.f32 %v794_v59, %v726_v4 }
 0x15d   :  { %v796_v19 = vadd.f32 %v795_v30, %v727_v29 }
 0x15f   :  { %v797_v34 = vadd.f32 %v796_v19, %v728_v2 }
 0x161   :  { %v798_v38 = vadd.f32 %v797_v34, %v729_v35 }
 0x163   :  { %v799_v26 = vadd.f32 %v798_v38, %v730_v36 }
 0x165   :  { %v800_v42 = vadd.f32 %v799_v26, %v731_v39 }
 0x167   :  { %v801_v28 = vrot.slane %v800_v42, 4 }
 0x169   :  { %v802_v24 = vadd.f32 %v801_v28, %v800_v42 }
 0x16b   :  { %v803_v45 = vrot.slane %v802_v24, 2 }
 0x16d   :  { %v804_v14 = vadd.f32 %v803_v45, %v802_v24 }
 0x16f   :  { %v805_v46 = vrot.slane %v804_v14, 1 }
 0x171   :  { %v806_v40 = vadd.f32 %v805_v46, %v804_v14 }
 0x173   :  { %v810_v25 = vsel %vm809_vm3, %v806_v40, %v769_v48 }
 0x174   :  { %v812_v54 = vadd.f32 %v810_v25, %v732_v52 }
 0x176   :  { %813 = vst [vmem:[#allocation2] sm:$0x3] %v812_v54 }
 0x17d   :  { %v817_v47 = vld [vmem:[#allocation2] sm:$0x3] }
 0x17e   :  { %v818_v55 = vmul.f32 0.00390625, %v817_v47 }
 0x180   :  { %v819_v50 = vpack.c.bf16 %v818_v55, %v818_v55 }
 0x182   :  { %1154 = vmatmul.mubr.bf16.vlgmr.msra.gmra.mrb[28].mxu1 %v819_v50 }
 0x255   :  { %v925_v56 = vpop.f32.mrb[28].mxu1 }
 0x256   :  { %v926_v57 = vadd.f32 %v1014_v41, %v925_v56  ;;  %v1155_v49 = vpop.f32.mrb[29].mxu1 }
 0x257   :  { %v928_v60 = vpop.f32.mrb[30].mxu1 }
 0x258   :  { %931 = vst [vmem:[#allocation3] sm:$0x3] %v926_v57  ;;  %v1156_v1 = vpop.f32.mrb[31].mxu1 }
 0x259   :  { %1222 = shalt.err (!%p1219_p4)
}
 0x25a   :  { %s1223_s4 = scalar_lea.hbm %s1616_s5, 32 }
 0x25b   :  { %p1224_p5 = scmp.ne.s32.totalorder %s1616_s5, %s1223_s4  ;;  %p1227_p6 = scmp.lt.u32.totalorder %s1223_s4, %s1616_s5 }
 0x25d   :  { %p1229_p7 = pnand %p1227_p6, %p1224_p5 }
 0x25f   :  { %1232 = shalt.err (!%p1229_p7)
}
 0x260   :  { %941 = dma.vmem_to_hbm [thread:$0]  %s939_s1, 32, %s1616_s5, [#allocation4]  }
 0x261   :  { %1233 = dma.done.wait [#allocation4], 32  }
 0x262   :  { %1234 = vsyncadd [#allocation4], 4294967264 }
 0x263   :  { %945 = vsyncpa [#allocation4], 1 }

</bundles_post_ra>
